<compile_context>
chip_gen: v7x
topology: tpu7x:2x2x1
jax: 0.10.0
libtpu: 0.0.40
codegen_flags: <defaults>
</compile_context>

<pallas_src>
import functools

import jax
import jax.numpy as jnp
from jax.experimental import pallas as pl
from jax.experimental.pallas import tpu as pltpu


def _round_up(x, m):
    return ((x + m - 1) // m) * m


def _vmem_capacity_bytes():
    """Physical VMEM of the local TPU generation (conservative fallback)."""
    try:
        info = pltpu.get_tpu_info()
        for name in ("vmem_capacity_bytes", "vmem_bytes"):
            cap = getattr(info, name, None)
            if cap:
                return int(cap)
    except Exception:
        pass
    return 64 * 1024 * 1024  # v7x physical per-core VMEM; safe everywhere.


def _partial_sums_kernel(pred_ref, targ_ref, out_ref, *, tg, tf, g_total,
                         f_total, ragged_g, ragged_f):
    """Per-tile lane-resolved partial sums [sum|t-p|, sum (t-p)^2, sum t^2]."""
    p = pred_ref[...].astype(jnp.float32)
    t = targ_ref[...].astype(jnp.float32)

    def _reduce(v):                       # (tg, tf, T) -> (T,)
        return jnp.sum(jnp.sum(v, axis=0), axis=0)

    def emit(pp, tt):
        d = tt - pp
        out_ref[0, 0, :] = _reduce(jnp.abs(d))
        out_ref[0, 1, :] = _reduce(d * d)
        out_ref[0, 2, :] = _reduce(tt * tt)

    if not (ragged_g or ragged_f):
        emit(p, t)
        return

    # Only boundary tiles (which read past the logical array end) pay for the
    # iota mask; all interior tiles take the unmasked fast path.
    conds = []
    if ragged_g:
        conds.append((pl.program_id(0) + 1) * tg > g_total)
    if ragged_f:
        conds.append((pl.program_id(1) + 1) * tf > f_total)
    needs_mask = conds[0] if len(conds) == 1 else jnp.logical_or(conds[0], conds[1])

    @pl.when(jnp.logical_not(needs_mask))
    def _():
        emit(p, t)

    @pl.when(needs_mask)
    def _():
        keep = None
        if ragged_g:
            g_ids = jax.lax.broadcasted_iota(jnp.int32, p.shape, 0)
            keep = g_ids < (g_total - pl.program_id(0) * tg)
        if ragged_f:
            f_ids = jax.lax.broadcasted_iota(jnp.int32, p.shape, 1)
            kf = f_ids < (f_total - pl.program_id(1) * tf)
            keep = kf if keep is None else jnp.logical_and(keep, kf)
        emit(jnp.where(keep, p, 0.0), jnp.where(keep, t, 0.0))


@jax.jit
def multi_resolution_spectral_loss(pred_spec, target_spec):
    assert pred_spec.shape == target_spec.shape
    n_elem = pred_spec.size
    shape = pred_spec.shape

    # Collapse only the leading dims; the (sublane, lane) tiling lives on the
    # last two dims, so this reshape is a free view (no HBM relayout copy).
    if pred_spec.ndim == 0:
        G, F, T = 1, 1, 1
    elif pred_spec.ndim == 1:
        G, F, T = 1, 1, shape[0]
    else:
        T = shape[-1]
        F = shape[-2]
        G = 1
        for s in shape[:-2]:
            G *= s
    p3 = pred_spec.reshape(G, F, T)
    t3 = target_spec.reshape(G, F, T)

    itemsize = jnp.dtype(pred_spec.dtype).itemsize
    sub = max(8, 32 // itemsize)            # sublane tile: 8 f32, 16 bf16, 32 i8
    lanes = _round_up(T, 128)
    slab_rows = _round_up(F, sub)
    slab_bytes = slab_rows * lanes * itemsize   # VMEM footprint of one (F,T) slab

    # Generation-aware sizing: ~75% of physical VMEM as the compiler limit,
    # ~70% of that for the 2 inputs x 2 pipeline buffers.
    vmem_limit = int(_vmem_capacity_bytes() * 3 // 4)
    tile_budget = (vmem_limit * 7) // 10

    if 4 * slab_bytes <= tile_budget or F <= sub:
        # Common case: block holds whole (F, T) slabs; tile only the G axis.
        tg_cap = max(1, tile_budget // (4 * slab_bytes))
        n_g = max(pl.cdiv(G, tg_cap), 2 if G >= 2 else 1)  # >=2 tiles: pipelining + v7x 2-TC balance
        tg = pl.cdiv(G, n_g)
        n_g = pl.cdiv(G, tg)
        tf, n_f = F, 1
    else:
        # Huge single slab: additionally tile the F (sublane) axis.
        # TODO(synk): a single (sub, T) row-chunk exceeding VMEM (astronomical T)
        # is not handled; no realistic spectrogram hits that.
        row_bytes = lanes * itemsize
        tf_cap = max(sub, (tile_budget // (4 * row_bytes)) // sub * sub)
        tf = tf_cap if tf_cap < F else F
        tg, n_g = 1, G
        n_f = pl.cdiv(F, tf)

    ragged_g = (n_g * tg) != G
    ragged_f = (n_f * tf) != F
    n_blocks = n_g * n_f

    kernel = functools.partial(
        _partial_sums_kernel, tg=tg, tf=tf, g_total=G, f_total=F,
        ragged_g=ragged_g, ragged_f=ragged_f)

    cost = pl.CostEstimate(
        flops=7 * n_elem,
        transcendentals=0,
        bytes_accessed=2 * n_elem * itemsize + n_blocks * 3 * T * 4)

    partials = pl.pallas_call(
        kernel,
        out_shape=jax.ShapeDtypeStruct((n_blocks, 3, T), jnp.float32),
        grid=(n_g, n_f),
        in_specs=[
            pl.BlockSpec((tg, tf, T), lambda g, f: (g, f, 0)),
            pl.BlockSpec((tg, tf, T), lambda g, f: (g, f, 0)),
        ],
        out_specs=pl.BlockSpec((1, 3, T), lambda g, f: (g * n_f + f, 0, 0)),
        compiler_params=pltpu.CompilerParams(
            dimension_semantics=("parallel", "parallel"),
            vmem_limit_bytes=vmem_limit,
        ),
        cost_estimate=cost,
    )(p3, t3)

    # Tiny epilogue reduction + scalar math in plain JAX (fused under jit).
    sums = jnp.sum(partials, axis=(0, 2))   # (3,): [sum|d|, sum d^2, sum t^2]
    l1 = sums[0] / n_elem
    sc = jnp.sqrt(sums[1]) / jnp.sqrt(sums[2])
    return (l1 + sc).astype(jnp.float32)


def _reference(pred_spec, target_spec):
    l1 = jnp.mean(jnp.abs(pred_spec - target_spec))
    sc = (jnp.linalg.norm((target_spec - pred_spec).reshape(-1))
          / jnp.linalg.norm(target_spec.reshape(-1)))
    return l1 + sc


if __name__ == "__main__":
    key = jax.random.PRNGKey(0)
    k1, k2 = jax.random.split(key)
    # Small "spectrogram" tensors: (batch=2, channels=4, freq=16, time=16).
    pred_spec = jax.random.normal(k1, (2, 4, 16, 16), dtype=jnp.float32)
    target_spec = jax.random.normal(k2, (2, 4, 16, 16), dtype=jnp.float32)

    loss = multi_resolution_spectral_loss(pred_spec, target_spec)
    loss = jax.block_until_ready(loss)

    ref = _reference(pred_spec, target_spec)
    assert jnp.allclose(loss, ref, rtol=1e-5, atol=1e-5), (loss, ref)
    print("KERNEL_OK")
</pallas_src>

<mosaic_0001>
module attributes {stable_mosaic.version = 11 : i64} {
  func.func @_partial_sums_kernel(%arg0: i32, %arg1: i32, %arg2: memref<4x16x16xf32, #tpu.memory_space<vmem>>, %arg3: memref<4x16x16xf32, #tpu.memory_space<vmem>>, %arg4: memref<1x3x16xf32, #tpu.memory_space<vmem>>) attributes {dimension_semantics = [#tpu.dimension_semantics<parallel>, #tpu.dimension_semantics<parallel>], iteration_bounds = array<i64: 2, 1>, scalar_prefetch = 0 : i64, scratch_operands = 0 : i64, tpu.core_type = #tpu.core_type<tc>, window_params = [{transform_indices = @transform_0, window_bounds = array<i64: 4, 16, 16>}, {transform_indices = @transform_1, window_bounds = array<i64: 4, 16, 16>}, {transform_indices = @transform_2, window_bounds = array<i64: 1, 3, 16>}]} {
    %c0 = arith.constant 0 : index
    %c0_0 = arith.constant 0 : index
    %c0_1 = arith.constant 0 : index
    %0 = vector.load %arg2[%c0, %c0_0, %c0_1] : memref<4x16x16xf32, #tpu.memory_space<vmem>>, vector<4x16x16xf32>
    %c0_2 = arith.constant 0 : index
    %c0_3 = arith.constant 0 : index
    %c0_4 = arith.constant 0 : index
    %1 = vector.load %arg3[%c0_2, %c0_3, %c0_4] : memref<4x16x16xf32, #tpu.memory_space<vmem>>, vector<4x16x16xf32>
    %2 = arith.subf %1, %0 : vector<4x16x16xf32>
    %3 = math.absf %2 : vector<4x16x16xf32>
    %cst = arith.constant dense<0.000000e+00> : vector<16x16xf32>
    %4 = vector.multi_reduction <add>, %3, %cst [0] : vector<4x16x16xf32> to vector<16x16xf32>
    %cst_5 = arith.constant dense<0.000000e+00> : vector<16xf32>
    %5 = vector.multi_reduction <add>, %4, %cst_5 [0] : vector<16x16xf32> to vector<16xf32>
    %c0_6 = arith.constant 0 : index
    %c0_7 = arith.constant 0 : index
    %c0_8 = arith.constant 0 : index
    %6 = vector.load %arg4[%c0_6, %c0_7, %c0_8] : memref<1x3x16xf32, #tpu.memory_space<vmem>>, vector<1x1x16xf32>
    %7 = vector.shape_cast %6 : vector<1x1x16xf32> to vector<16xf32>
    %8 = vector.shape_cast %5 : vector<16xf32> to vector<1x1x16xf32>
    tpu.vector_store %arg4[%c0_6, %c0_7, %c0_8], %8 {strides = array<i32>} : memref<1x3x16xf32, #tpu.memory_space<vmem>>, vector<1x1x16xf32>,
    %9 = arith.mulf %2, %2 : vector<4x16x16xf32>
    %cst_9 = arith.constant dense<0.000000e+00> : vector<16x16xf32>
    %10 = vector.multi_reduction <add>, %9, %cst_9 [0] : vector<4x16x16xf32> to vector<16x16xf32>
    %cst_10 = arith.constant dense<0.000000e+00> : vector<16xf32>
    %11 = vector.multi_reduction <add>, %10, %cst_10 [0] : vector<16x16xf32> to vector<16xf32>
    %c0_11 = arith.constant 0 : index
    %c1 = arith.constant 1 : index
    %c0_12 = arith.constant 0 : index
    %12 = vector.load %arg4[%c0_11, %c1, %c0_12] : memref<1x3x16xf32, #tpu.memory_space<vmem>>, vector<1x1x16xf32>
    %13 = vector.shape_cast %12 : vector<1x1x16xf32> to vector<16xf32>
    %14 = vector.shape_cast %11 : vector<16xf32> to vector<1x1x16xf32>
    tpu.vector_store %arg4[%c0_11, %c1, %c0_12], %14 {strides = array<i32>} : memref<1x3x16xf32, #tpu.memory_space<vmem>>, vector<1x1x16xf32>,
    %15 = arith.mulf %1, %1 : vector<4x16x16xf32>
    %cst_13 = arith.constant dense<0.000000e+00> : vector<16x16xf32>
    %16 = vector.multi_reduction <add>, %15, %cst_13 [0] : vector<4x16x16xf32> to vector<16x16xf32>
    %cst_14 = arith.constant dense<0.000000e+00> : vector<16xf32>
    %17 = vector.multi_reduction <add>, %16, %cst_14 [0] : vector<16x16xf32> to vector<16xf32>
    %c0_15 = arith.constant 0 : index
    %c2 = arith.constant 2 : index
    %c0_16 = arith.constant 0 : index
    %18 = vector.load %arg4[%c0_15, %c2, %c0_16] : memref<1x3x16xf32, #tpu.memory_space<vmem>>, vector<1x1x16xf32>
    %19 = vector.shape_cast %18 : vector<1x1x16xf32> to vector<16xf32>
    %20 = vector.shape_cast %17 : vector<16xf32> to vector<1x1x16xf32>
    tpu.vector_store %arg4[%c0_15, %c2, %c0_16], %20 {strides = array<i32>} : memref<1x3x16xf32, #tpu.memory_space<vmem>>, vector<1x1x16xf32>,
    return
  }
  func.func @transform_0(%arg0: i32, %arg1: i32) -> (i32, i32, i32) {
    %c0_i32 = arith.constant 0 : i32
    %c0_i32_0 = arith.constant 0 : i32
    return %arg0, %arg1, %c0_i32 : i32, i32, i32
  }
  func.func @transform_1(%arg0: i32, %arg1: i32) -> (i32, i32, i32) {
    %c0_i32 = arith.constant 0 : i32
    %c0_i32_0 = arith.constant 0 : i32
    return %arg0, %arg1, %c0_i32 : i32, i32, i32
  }
  func.func @transform_2(%arg0: i32, %arg1: i32) -> (i32, i32, i32) {
    %c1_i32 = arith.constant 1 : i32
    %0 = arith.muli %arg0, %c1_i32 : i32
    %1 = arith.addi %0, %arg1 : i32
    %c0_i32 = arith.constant 0 : i32
    %c0_i32_0 = arith.constant 0 : i32
    %c0_i32_1 = arith.constant 0 : i32
    return %1, %c0_i32, %c0_i32_0 : i32, i32, i32
  }
}

</mosaic_0001>

<bundles_post_ra>
// kernel: multi_resolution_spectral_loss.1
= control target key start
LH: loop header
LB: loop body
LE: loop exit
PB: predicated region body
PF: predicated region fallthrough
CT: control target
= control target key end

     0   :  { %7 = vsyncpa [#allocation3], 0  ;;  %s904_s0 = inlined_call_operand.hbm [shape: f32[8,16,16], index: 0, kind: input, shape index: {}]   ;;  %s905_s1 = inlined_call_operand.hbm [shape: f32[8,16,16], index: 1, kind: input, shape index: {}]   ;;  %s906_s2 = inlined_call_operand.vmem [shape: f32[2,3,16], index: 2, kind: output, shape index: {}]  }
   0x1   :  { %9 = vsyncpa [#allocation3 + $0x1], 0 }
   0x2   :  { %10 = vsyncpa [#allocation5], 0 }
   0x3   :  { %12 = vsyncpa [#allocation5 + $0x1], 0  ;;  %s679_s9 = smov 0   ;;  %s681_s10 = smov 0  }
   0x4   :  { %s683_s11 = smov 0   ;;  %s685_s12 = smov 0  }
   0x5   :  { %s687_s13 = smov 0   ;;  %s689_s14 = smov 0  }
   0x6 LB: > { %s460_s15 = sadd.s32 4294967295, %s658_s14   ;;  %s30_s16 = sadd.s32 1, %s654_s13  ;;  %s658_s14 = sphi %s689_s14, %s18_s14   ;;  %s654_s13 = sphi %s687_s13, %s917_s13   ;;  %s650_s12 = sphi %s685_s12, %s916_s12   ;;  %s646_s11 = sphi %s683_s11, %s915_s11   ;;  %s642_s10 = sphi %s681_s10, %s914_s10   ;;  %s638_s9 = sphi %s679_s9, %s913_s9  }
   0x7   : > { %p32_p0 = scmp.ge.s32.totalorder %s30_s16, 2  ;;  %s39_s17 = sadd.s32 1, %s646_s11 }
   0x8   : > { %p46_p1 = scmp.ne.s32.totalorder %s646_s11, %s642_s10  ;;  %p47_p2 = scmp.eq.s32.totalorder %s658_s14, 0 }
   0x9   : > { %s919_s16 = smov (%p32_p0, %s30_s16), 0  ;;  %p52_p4 = scmp.ne.s32.totalorder %s642_s10, %s638_s9 }
   0xa   : > { %p715_p3 = por %p47_p2, %p46_p1  ;;  %s34_s19 = ssub.s32 %s654_s13, %s919_s16 }
   0xb   : > { %p53_p5 = scmp.eq.s32.totalorder %s460_s15, 0  ;;  %p37_p6 = scmp.eq.s32.totalorder %s34_s19, 0 }
   0xc   : > { %p493_p8 = scmp.lt.s32.totalorder %s658_s14, 2  ;;  %s731_s22 = sand.u32 1, %s646_s11  }
   0xd   : > { %p722_p7 = por %p53_p5, %p52_p4  ;;  %s479_s23 = sshll.u32 %s654_s13, 10 }
   0xe   : > { %s728_s21 = scalar_select %p37_p6, %s646_s11, %s39_s17  }
   0xf   : > { %s909_s20 = scalar_select %p722_p7, 1, 0 }
  0x10   : > { %s464_s24 = sshll.u32 %s731_s22, 6  ;;  %s740_s27 = scalar_lea.hbm %s904_s0, %s479_s23 }
  0x11   : > { %s136_s28 = scalar_lea.vmem [#allocation2], %s464_s24  ;;  %p746_p9 = pnand %p493_p8, %p715_p3 }
  0x12   : > { %s146_s29 = sshll.u32 %s136_s28, 4  ;;  %s133_s3 = scalar_lea.sflag [#allocation3], %s731_s22  ;;  %s750_s29 = int_to_ptr.vmem [resolvable:$true] %s146_s29 }
  0x13   : > { %s544_s4 = scalar_lea.hbm %s740_s27, 1024  ;;  %p546_p11 = pneg %p746_p9 }
  0x14   : > { %p545_p10 = scmp.ne.s32.totalorder %s740_s27, %s544_s4  ;;  %s549_s7 = scalar_lea.hbm %s904_s0, 2048 }
  0x15   : > { %p550_p0 = scmp.lt.u32.totalorder %s740_s27, %s904_s0  ;;  %p551_p1 = scmp.lt.u32.totalorder %s549_s7, %s544_s4 }
  0x16   : > { %p547_p12 = pnand %p546_p11, %p545_p10  ;;  %p553_p3 = scmp.lt.u32.totalorder %s544_s4, %s740_s27 }
  0x17   : > { %p552_p2 = por %p551_p1, %p550_p0 }
  0x18   : > { %p548_p13 = pneg %p547_p12 }
  0x19   : > { %p554_p4 = por %p553_p3, %p552_p2 }
  0x1b   : > { %p555_p5 = pnand %p554_p4, %p548_p13 }
  0x1d   : > { %558 = shalt.err (!%p555_p5)
}
  0x1e   : > { %s559_s15 = scalar_lea.vmem %s750_s29, 1024  ;;  %s660_s17 = smov [#allocation2]  }
  0x1f   : > { %p560_p6 = scmp.ne.s32.totalorder %s750_s29, %s559_s15  ;;  %s564_s18 = sshll.u32 %s660_s17, 4  ;;  %s565_s18 = int_to_ptr.vmem [resolvable:$false] %s564_s18 }
  0x20   : > { %s566_s19 = scalar_lea.vmem %s565_s18, 2048  ;;  %p567_p12 = scmp.lt.s32.totalorder %s750_s29, %s565_s18 }
  0x21   : > { %p562_p8 = pnand %p560_p6, %p546_p11  ;;  %p568_p0 = scmp.lt.s32.totalorder %s566_s19, %s559_s15 }
  0x23   : > { %p563_p10 = pneg %p562_p8  ;;  %p569_p1 = por %p568_p0, %p567_p12 }
  0x25   : > { %p570_p2 = pnand %p569_p1, %p563_p10 }
  0x27   : > { %573 = shalt.err (!%p570_p2)
}
  0x28   : > { %s661_s25 = smov 128   ;;  %s662_s26 = smov 8  }
  0x29   : > { %489 = dma.hbm_to_vmem [thread:$0]  (!%p746_p9), %s740_s27, 1024, %s750_s29, %s133_s3, %s661_s25, %s661_s25, %s662_s26  }
  0x2a   : > { %p472_p13 = scmp.ge.s32.totalorder %s658_s14, 1  ;;  %p178_p3 = scmp.lt.s32.totalorder %s658_s14, 3 }
  0x2b   : > { %s794_s6 = scalar_lea.hbm %s905_s1, %s479_s23  ;;  %s160_s7 = scalar_lea.vmem [#allocation4], %s464_s24 }
  0x2c   : > { %p785_p4 = pnand %p472_p13, %p178_p3  ;;  %s170_s8 = sshll.u32 %s160_s7, 4  ;;  %s798_s8 = int_to_ptr.vmem [resolvable:$true] %s170_s8 }
  0x2d   : > { %s157_s27 = scalar_lea.sflag [#allocation5], %s731_s22  ;;  %s574_s29 = scalar_lea.hbm %s794_s6, 1024 }
  0x2e   : > { %p575_p5 = scmp.ne.s32.totalorder %s794_s6, %s574_s29  ;;  %s579_s23 = scalar_lea.hbm %s905_s1, 2048 }
  0x2f   : > { %p580_p10 = scmp.lt.u32.totalorder %s794_s6, %s905_s1  ;;  %p581_p12 = scmp.lt.u32.totalorder %s579_s23, %s574_s29 }
  0x30   : > { %p577_p6 = pnand %p575_p5, %p546_p11  ;;  %p583_p1 = scmp.lt.u32.totalorder %s574_s29, %s794_s6 }
  0x31   : > { %p582_p0 = por %p581_p12, %p580_p10 }
  0x32   : > { %p578_p8 = pneg %p577_p6 }
  0x33   : > { %p584_p2 = por %p583_p1, %p582_p0 }
  0x35   : > { %p585_p13 = pnand %p584_p2, %p578_p8 }
  0x37   : > { %588 = shalt.err (!%p585_p13)
}
  0x38   : > { %s589_s24 = scalar_lea.vmem %s798_s8, 1024  ;;  %s663_s18 = smov [#allocation4]  }
  0x39   : > { %p590_p3 = scmp.ne.s32.totalorder %s798_s8, %s589_s24  ;;  %s594_s19 = sshll.u32 %s663_s18, 4  ;;  %s595_s19 = int_to_ptr.vmem [resolvable:$false] %s594_s19 }
  0x3a   : > { %s596_s4 = scalar_lea.vmem %s595_s19, 2048  ;;  %p597_p7 = scmp.lt.s32.totalorder %s798_s8, %s595_s19 }
  0x3b   : > { %p592_p5 = pnand %p590_p3, %p546_p11  ;;  %p598_p10 = scmp.lt.s32.totalorder %s596_s4, %s589_s24 }
  0x3d   : > { %p593_p6 = pneg %p592_p5  ;;  %p599_p12 = por %p598_p10, %p597_p7 }
  0x3f   : > { %p600_p0 = pnand %p599_p12, %p593_p6 }
  0x41   : > { %603 = shalt.err (!%p600_p0)
}
  0x42   : > { %492 = dma.hbm_to_vmem [thread:$0]  (!%p746_p9), %s794_s6, 1024, %s798_s8, %s157_s27, %s661_s25, %s661_s25, %s662_s26  }
  0x43   : > { %182 = sbr.rel (%p785_p4) target bundleno = 121 (0x79), region = 28  ;;  %s184_s5 = sand.u32 (!%p785_p4), 1, %s642_s10  }
  0x44   : > { %s473_s7 = sshll.u32 (!%p785_p4), %s184_s5, 6  ;;  %s185_s29 = scalar_lea.sflag (!%p785_p4), [#allocation3], %s184_s5 }
  0x45   : > { %s188_s3 = scalar_lea.vmem (!%p785_p4), [#allocation2], %s473_s7  ;;  %p912_p7 = scmp.ne.s32.totalorder (!%p785_p4), %s909_s20, 0 }
  0x4a   : > { %629 = dma.done.wait (%p912_p7), %s185_s29, 1024  }
  0x4b   : > { %631 = vsyncadd (%p912_p7), %s185_s29, 4294966272  ;;  %s194_s30 = scalar_lea.sflag [#allocation5], %s184_s5  ;;  %s197_s22 = scalar_lea.vmem [#allocation4], %s473_s7 }
  0x4c   : > { %633 = dma.done.wait (%p912_p7), %s194_s30, 1024  }
  0x4d   : > { %635 = vsyncadd (%p912_p7), %s194_s30, 4294966272  ;;  %v233_v0 = vld [vmem:[%s188_s3] sm:$0xff]  ;;  %v234_v1 = vld [vmem:[%s188_s3 + $0x8] sm:$0xff]  ;;  %vm265_vm0 = vcmask 130048   ;;  %p228_p9 = scmp.lt.s32.totalorder %s650_s12, 1  ;;  %vm289_vm1 = vcmask 122880  }
  0x4e   : > { %v235_v2 = vld [vmem:[%s188_s3 + $0x10] sm:$0xff]  ;;  %v236_v3 = vld [vmem:[%s188_s3 + $0x18] sm:$0xff]  ;;  %v237_v4 = vld [vmem:[%s188_s3 + $0x20] sm:$0xff] }
  0x4f   : > { %v238_v5 = vld [vmem:[%s188_s3 + $0x28] sm:$0xff]  ;;  %v239_v6 = vld [vmem:[%s188_s3 + $0x30] sm:$0xff]  ;;  %v240_v7 = vld [vmem:[%s188_s3 + $0x38] sm:$0xff]  ;;  %s921_s12 = smov (!%p228_p9, %s650_s12), 1 }
  0x50   : > { %v241_v8 = vld [vmem:[%s197_s22] sm:$0xff]  ;;  %v242_v9 = vld [vmem:[%s197_s22 + $0x8] sm:$0xff]  ;;  %v243_v10 = vld [vmem:[%s197_s22 + $0x10] sm:$0xff]  ;;  %s475_s20 = sshll.u32 %s921_s12, 2 }
  0x51   : > { %v244_v11 = vld [vmem:[%s197_s22 + $0x18] sm:$0xff]  ;;  %v249_v12 = vsub.f32 %v241_v8, %v233_v0  ;;  %v840_v13 = vmul.f32 %v241_v8, %v241_v8  ;;  %v245_v14 = vld [vmem:[%s197_s22 + $0x20] sm:$0xff]  ;;  %v246_v15 = vld [vmem:[%s197_s22 + $0x28] sm:$0xff]  ;;  %v250_v17 = vsub.f32 %v242_v9, %v234_v1  ;;  %v251_v18 = vsub.f32 %v243_v10, %v235_v2  ;;  %s231_s28 = scalar_lea.vmem %s906_s2, %s475_s20 }
  0x52   : > { %v247_v16 = vld [vmem:[%s197_s22 + $0x30] sm:$0xff]  ;;  %v252_v19 = vsub.f32 %v244_v11, %v236_v3  ;;  %v842_v20 = vmul.f32 %v242_v9, %v242_v9  ;;  %v248_v21 = vld [vmem:[%s197_s22 + $0x38] sm:$0xff]  ;;  %v253_v22 = vsub.f32 %v245_v14, %v237_v4  ;;  %v254_v23 = vsub.f32 %v246_v15, %v238_v5 }
  0x53   : > { %v255_v24 = vsub.f32 %v247_v16, %v239_v6  ;;  %v257_v25 = vand.u32 2147483647, %v249_v12  ;;  %v256_v26 = vsub.f32 %v248_v21, %v240_v7  ;;  %v258_v27 = vand.u32 2147483647, %v250_v17 }
  0x54   : > { %v259_v28 = vand.u32 2147483647, %v251_v18  ;;  %v260_v29 = vand.u32 2147483647, %v252_v19  ;;  %v261_v30 = vand.u32 2147483647, %v253_v22  ;;  %v291_v33 = vmul.f32 %v249_v12, %v249_v12 }
  0x55   : > { %v262_v31 = vand.u32 2147483647, %v254_v23  ;;  %v263_v32 = vand.u32 2147483647, %v255_v24  ;;  %v264_v34 = vand.u32 2147483647, %v256_v26  ;;  %v292_v45 = vmul.f32 %v250_v17, %v250_v17 }
  0x56   : > { %v266_v35 = vsel %vm265_vm0, %v257_v25, 0.0  ;;  %v267_v36 = vsel %vm265_vm0, %v259_v28, 0.0  ;;  %v273_v37 = vsel %vm265_vm0, %v258_v27, 0.0  ;;  %v269_v39 = vsel %vm265_vm0, %v261_v30, 0.0 }
  0x57   : > { %v268_v38 = vadd.f32 %v267_v36, %v266_v35  ;;  %v271_v40 = vsel %vm265_vm0, %v263_v32, 0.0  ;;  %v274_v41 = vsel %vm265_vm0, %v260_v29, 0.0  ;;  %v276_v43 = vsel %vm265_vm0, %v262_v31, 0.0 }
  0x58   : > { %v275_v42 = vadd.f32 %v274_v41, %v273_v37  ;;  %v278_v44 = vsel %vm265_vm0, %v264_v34, 0.0  ;;  %v293_v47 = vmul.f32 %v251_v18, %v251_v18  ;;  %v294_v48 = vmul.f32 %v252_v19, %v252_v19 }
  0x59   : > { %v270_v46 = vadd.f32 %v269_v39, %v268_v38  ;;  %v295_v49 = vmul.f32 %v253_v22, %v253_v22  ;;  %v296_v51 = vmul.f32 %v254_v23, %v254_v23  ;;  %v297_v52 = vmul.f32 %v255_v24, %v255_v24 }
  0x5a   : > { %v277_v50 = vadd.f32 %v276_v43, %v275_v42  ;;  %v298_v53 = vmul.f32 %v256_v26, %v256_v26  ;;  %v299_v55 = vsel %vm265_vm0, %v291_v33, 0.0  ;;  %v300_v56 = vsel %vm265_vm0, %v293_v47, 0.0 }
  0x5b   : > { %v272_v54 = vadd.f32 %v271_v40, %v270_v46  ;;  %v302_v57 = vsel %vm265_vm0, %v295_v49, 0.0  ;;  %v301_v59 = vadd.f32 %v300_v56, %v299_v55  ;;  %v304_v60 = vsel %vm265_vm0, %v297_v52, 0.0 }
  0x5c   : > { %v279_v58 = vadd.f32 %v278_v44, %v277_v50  ;;  %v306_v61 = vsel %vm265_vm0, %v292_v45, 0.0  ;;  %v307_v63 = vsel %vm265_vm0, %v294_v48, 0.0  ;;  %v309_v0 = vsel %vm265_vm0, %v296_v51, 0.0 }
  0x5d   : > { %v280_v62 = vsel %vm265_vm0, %v272_v54, 0.0  ;;  %v311_v1 = vsel %vm265_vm0, %v298_v53, 0.0  ;;  %v303_v3 = vadd.f32 %v302_v57, %v301_v59  ;;  %v308_v4 = vadd.f32 %v307_v63, %v306_v61 }
  0x5e   : > { %v281_v2 = vsel %vm265_vm0, %v279_v58, 0.0  ;;  %v325_v5 = vmul.f32 %v243_v10, %v243_v10  ;;  %v326_v7 = vmul.f32 %v244_v11, %v244_v11  ;;  %v327_v8 = vmul.f32 %v245_v14, %v245_v14 }
  0x5f   : > { %v282_v6 = vadd.f32 %v281_v2, %v280_v62  ;;  %v328_v9 = vmul.f32 %v246_v15, %v246_v15  ;;  %v305_v12 = vadd.f32 %v304_v60, %v303_v3  ;;  %v310_v17 = vadd.f32 %v309_v0, %v308_v4 }
  0x60   : > { %v329_v18 = vmul.f32 %v247_v16, %v247_v16  ;;  %v330_v19 = vmul.f32 %v248_v21, %v248_v21  ;;  %v331_v23 = vsel %vm265_vm0, %v840_v13, 0.0  ;;  %v332_v24 = vsel %vm265_vm0, %v325_v5, 0.0 }
  0x61   : > { %v283_v22 = vrot.slane %v282_v6, 4  ;;  %v334_v25 = vsel %vm265_vm0, %v327_v8, 0.0  ;;  %v312_v10 = vadd.f32 %v311_v1, %v310_v17  ;;  %v313_v26 = vsel %vm265_vm0, %v305_v12, 0.0 }
  0x62   : > { %v333_v27 = vadd.f32 %v332_v24, %v331_v23  ;;  %v336_v11 = vsel %vm265_vm0, %v329_v18, 0.0  ;;  %v338_v15 = vsel %vm265_vm0, %v842_v20, 0.0  ;;  %v339_v16 = vsel %vm265_vm0, %v326_v7, 0.0 }
  0x63   : > { %v284_v14 = vadd.f32 %v283_v22, %v282_v6  ;;  %v341_v13 = vsel %vm265_vm0, %v328_v9, 0.0  ;;  %v314_v21 = vsel %vm265_vm0, %v312_v10, 0.0  ;;  %v340_v29 = vadd.f32 %v339_v16, %v338_v15 }
  0x64   : > { %v335_v28 = vadd.f32 %v334_v25, %v333_v27  ;;  %v315_v31 = vadd.f32 %v314_v21, %v313_v26  ;;  %v343_v32 = vsel %vm265_vm0, %v330_v19, 0.0 }
  0x65   : > { %v285_v30 = vrot.slane %v284_v14, 2  ;;  %v342_v34 = vadd.f32 %v341_v13, %v340_v29 }
  0x66   : > { %v337_v33 = vadd.f32 %v336_v11, %v335_v28  ;;  %v316_v36 = vrot.slane %v315_v31, 4 }
  0x67   : > { %v286_v35 = vadd.f32 %v285_v30, %v284_v14  ;;  %v344_v37 = vadd.f32 %v343_v32, %v342_v34 }
  0x68   : > { %v345_v20 = vsel %vm265_vm0, %v337_v33, 0.0  ;;  %v317_v39 = vadd.f32 %v316_v36, %v315_v31 }
  0x69   : > { %v287_v38 = vrot.slane %v286_v35, 1  ;;  %v346_v40 = vsel %vm265_vm0, %v344_v37, 0.0 }
  0x6a   : > { %v318_v42 = vrot.slane %v317_v39, 2  ;;  %v347_v43 = vadd.f32 %v346_v40, %v345_v20 }
  0x6b   : > { %v288_v41 = vadd.f32 %v287_v38, %v286_v35 }
  0x6c   : > { %v319_v44 = vadd.f32 %v318_v42, %v317_v39  ;;  %v348_v45 = vrot.slane %v347_v43, 4 }
  0x6d   : > { %290 = vst.msk [vmem:[%s231_s28] sm:$0x1] %vm289_vm1, %v288_v41 }
  0x6e   : > { %v320_v46 = vrot.slane %v319_v44, 1  ;;  %v349_v47 = vadd.f32 %v348_v45, %v347_v43 }
  0x70   : > { %v321_v48 = vadd.f32 %v320_v46, %v319_v44  ;;  %v350_v49 = vrot.slane %v349_v47, 2 }
  0x72   : > { %322 = vst.msk [vmem:[%s231_s28 + $0x1] sm:$0x1] %vm289_vm1, %v321_v48  ;;  %v351_v50 = vadd.f32 %v350_v49, %v349_v47 }
  0x74   : > { %v352_v51 = vrot.slane %v351_v50, 1 }
  0x76   : > { %v353_v52 = vadd.f32 %v352_v51, %v351_v50 }
  0x78   : > { %354 = vst.msk [vmem:[%s231_s28 + $0x2] sm:$0x1] %vm289_vm1, %v353_v52 }
  0x79 PF: > { %s18_s14 = sadd.s32 1, %s658_s14   ;;  %s913_s9 = smov %s642_s10 }
  0x7a   : > { %p15_p11 = scmp.ge.s32.totalorder %s18_s14, 4   ;;  %s914_s10 = smov %s646_s11 }
  0x7b   : > { %s915_s11 = smov %s728_s21  ;;  %s916_s12 = smov %s654_s13 }
  0x7c   : > { %s917_s13 = smov %s919_s16  ;;  %17 = sbr.rel (!%p15_p11) target bundleno = 6 (0x6), region = 81 }
  0x83   :  { %377 = vsyncpa [#allocation3], 1 }
  0x84   :  { %379 = vsyncpa [#allocation3 + $0x1], 1 }
  0x85   :  { %380 = vsyncpa [#allocation5], 1 }
  0x86   :  { %382 = vsyncpa [#allocation5 + $0x1], 1 }

</bundles_post_ra>
